<compile_context>
chip_gen: v6e
topology: v6e:2x2x1
jax: 0.10.0
libtpu: 0.0.40
codegen_flags: <defaults>
</compile_context>

<pallas_src>
import functools

import jax
import jax.numpy as jnp
from jax import lax
from jax.experimental import pallas as pl
from jax.experimental.pallas import tpu as pltpu


# ------------------------------ activations --------------------------------

def make_actv(name):
    """JAX equivalents of libs.modules.make_actv (applied inside the kernel)."""
    if name == 'relu':
        return lambda x: jnp.maximum(x, 0.0)
    elif name == 'leaky_relu':
        return lambda x: jnp.where(x >= 0, x, 0.2 * x)
    elif name == 'exp':
        return jnp.exp
    elif name == 'sigmoid':
        return jax.nn.sigmoid
    elif name == 'tanh':
        return jnp.tanh
    elif name == 'softplus':
        return lambda x: jnp.log(1.0 + jnp.exp(x - 1.0))
    elif name == 'linear':
        return lambda x: x
    raise NotImplementedError('invalid activation function: {:s}'.format(name))


# ------------------------------ Pallas kernel -------------------------------

def _ffc_pointwise_kernel(x_ref, wr_ref, wi_ref, br_ref, bi_ref,
                          or_ref, oi_ref, *, actv_fn):
    """Fused Fourier-domain pointwise block for one (batch, spatial-tile).

        out_re = actv(W_re @ X + shift_re)      # scale pre-folded into W
        out_im = actv(W_im @ X + shift_im)

    Block shapes (leading batch dim squeezed away):
        x_ref         : (2*Cin, TM)   bf16   -- stacked [real | imag] channels
        wr_ref/wi_ref : (Cout/2, 2*Cin) bf16 -- resident (constant index_map)
        br_ref/bi_ref : (Cout/2, 1)   f32    -- resident BN shift halves
        or_ref/oi_ref : (Cout/2, TM)  f32
    TM (flattened D*H*W tile) lives on the lane axis -> lane-dense, unmasked
    loads/stores; no (Cout, TM) intermediate is materialized.
    """
    x = x_ref[...]
    yr = jnp.dot(wr_ref[...], x, preferred_element_type=jnp.float32)
    or_ref[...] = actv_fn(yr + br_ref[...]).astype(or_ref.dtype)
    yi = jnp.dot(wi_ref[...], x, preferred_element_type=jnp.float32)
    oi_ref[...] = actv_fn(yi + bi_ref[...]).astype(oi_ref.dtype)
    # TODO(synk): if profiling shows this store-bound on v5e, emit bf16 outputs
    # (halves vst count) and upcast before the iFFT.


# --------------------------- VMEM-aware tile picker --------------------------

def _vmem_limit_bytes():
    """Generation-aware scoped-VMEM limit: ~48 MiB on v7x (64 MiB physical per
    TensorCore), up to ~96 MiB on v5e/v6e (128 MiB physical)."""
    cap = 64 * 1024 * 1024   # conservative fallback: v7x
    try:
        info = pltpu.get_tpu_info()
        cap = int(getattr(info, 'vmem_capacity_bytes', cap) or cap)
    except Exception:
        pass
    return min(cap * 3 // 4, 96 * 1024 * 1024)


def _pick_tile_m(m, k, c_half, bs, vmem_limit):
    """Largest multiple-of-128 spatial tile such that
       (a) the double-buffered bf16 input tile + both double-buffered f32
           output tiles fit in ~80% of the VMEM limit (headroom for resident
           weights/shifts and Mosaic internal scratch), and
       (b) there are at least ~4 grid steps total (bs * n_m >= 4) so BlockSpec
           double-buffering reaches steady state and both v7x TCs get work."""
    budget = int(vmem_limit * 0.8)
    # bytes per spatial column: 2x-buffered bf16 input (k rows) +
    # two 2x-buffered f32 outputs (c_half rows each)
    per_col = 2 * (k * 2) + 2 * (2 * c_half * 4)
    tm_budget = max(128, (budget // per_col) // 128 * 128)
    target_tiles = -(-4 // bs)                       # ceil(4 / bs) tiles/batch
    tm_steps = max(128, (m // max(1, target_tiles)) // 128 * 128)
    tm = min(tm_budget, tm_steps)
    return m if tm >= m else tm


# ------------------------------- forward pass --------------------------------

def ffc3d_forward(x, params, *, actv='relu', tm=None):
    """FFC3d.forward (pe=False).  x: complex64 NCDHW (bs, Cin, D, H, W)."""
    # TODO(synk): pe=True (3 extra meshgrid coordinate channels) not implemented.
    bs, cc, d, h, w_sp = x.shape
    m = d * h * w_sp
    k_dim = 2 * cc                                  # [real | imag] input channels

    xf = jnp.fft.fftshift(jnp.fft.fftn(x, axes=(-3, -2, -1), norm='ortho'),
                          axes=(-3, -2, -1))
    # Single stacked operand: channels-first, flattened spatial on lanes.
    # bf16 inputs: kernel is HBM-BW bound; matmul accumulates in f32.
    xcat = jnp.concatenate([jnp.real(xf), jnp.imag(xf)], axis=1)
    xcat = xcat.reshape(bs, k_dim, m).astype(jnp.bfloat16)

    w_full = params['w']                            # (Cout, 2*Cin)
    cout = w_full.shape[0]
    assert w_full.shape[1] == k_dim, (w_full.shape, cc)
    c_half = cout // 2                              # complex output channels

    # Fold eval-mode BatchNorm scale into the conv weight; split into the
    # real/imag output halves so the kernel writes each output directly.
    scale = params['scale'].astype(jnp.float32)
    shift = params['shift'].astype(jnp.float32)
    w_scaled = scale[:, None] * w_full.astype(jnp.float32)
    wr = w_scaled[:c_half].astype(jnp.bfloat16)
    wi = w_scaled[c_half:].astype(jnp.bfloat16)
    br = shift[:c_half].reshape(c_half, 1)
    bi = shift[c_half:].reshape(c_half, 1)

    vmem_limit = _vmem_limit_bytes()
    if tm is None:
        tm = _pick_tile_m(m, k_dim, c_half, bs, vmem_limit)
    n_m = pl.cdiv(m, tm)

    grid_spec = pltpu.PrefetchScalarGridSpec(
        num_scalar_prefetch=0,
        grid=(bs, n_m),
        in_specs=[
            # Stacked [real|imag] input tile; leading batch dim squeezed.
            pl.BlockSpec((pl.Squeezed(), k_dim, tm), lambda b, j: (b, 0, j)),
            # Resident weights / shifts (constant index_map -> DMA'd once).
            pl.BlockSpec((c_half, k_dim), lambda b, j: (0, 0)),
            pl.BlockSpec((c_half, k_dim), lambda b, j: (0, 0)),
            pl.BlockSpec((c_half, 1), lambda b, j: (0, 0)),
            pl.BlockSpec((c_half, 1), lambda b, j: (0, 0)),
        ],
        out_specs=(
            pl.BlockSpec((pl.Squeezed(), c_half, tm), lambda b, j: (b, 0, j)),
            pl.BlockSpec((pl.Squeezed(), c_half, tm), lambda b, j: (b, 0, j)),
        ),
    )

    kernel = functools.partial(_ffc_pointwise_kernel, actv_fn=make_actv(actv))
    yr, yi = pl.pallas_call(
        kernel,
        out_shape=(jax.ShapeDtypeStruct((bs, c_half, m), jnp.float32),
                   jax.ShapeDtypeStruct((bs, c_half, m), jnp.float32)),
        grid_spec=grid_spec,
        compiler_params=pltpu.CompilerParams(
            dimension_semantics=("parallel", "parallel"),
            vmem_limit_bytes=vmem_limit),
    )(xcat, wr, wi, br, bi)

    yc = lax.complex(yr.reshape(bs, c_half, d, h, w_sp),
                     yi.reshape(bs, c_half, d, h, w_sp))
    yc = jnp.fft.ifftn(jnp.fft.ifftshift(yc, axes=(-3, -2, -1)),
                       axes=(-3, -2, -1), norm='ortho')
    return yc


def res_ffc3d_forward(x, params, *, actv='relu'):
    """ResFFC3d.forward with bottleneck=False.  x: complex64 (bs, plane, D, H, W)."""
    # TODO(synk): the bottleneck=True path of the reference module is
    # channel-inconsistent (FFC3d(hid_plane, ...) expects 2*hid_plane input
    # channels but receives hid_plane//2 complex channels after the split), so
    # it cannot run in PyTorch either and is not implemented here.
    dx = ffc3d_forward(x, params, actv=actv)
    return x + dx


def init_res_ffc3d(key, plane, norm='batch', eps=1e-5):
    """Deterministic synthetic parameters for ResFFC3d(plane, bottleneck=False).

    The FFC3d 1x1 Conv3d weight (2*plane, 2*plane, 1, 1, 1) is stored as a
    (Cout, Cin) matrix.  BatchNorm3d is applied in inference (eval) mode with
    its running statistics folded into per-channel scale/shift.
    """
    # TODO(synk): training-mode BatchNorm batch statistics and the
    # 'instance'/'max' norms are not implemented (would need a cross-tile
    # reduction); 'batch' here means eval-mode running stats.
    cin = 2 * plane
    cout = 2 * plane
    kw, kg, kb, km, kv = jax.random.split(key, 5)
    w = 0.1 * jax.random.normal(kw, (cout, cin), jnp.float32)
    if norm == 'batch':
        gamma = 1.0 + 0.1 * jax.random.normal(kg, (cout,), jnp.float32)
        beta = 0.1 * jax.random.normal(kb, (cout,), jnp.float32)
        r_mean = 0.1 * jax.random.normal(km, (cout,), jnp.float32)
        r_var = 1.0 + 0.1 * jax.random.uniform(kv, (cout,), jnp.float32)
        scale = gamma * lax.rsqrt(r_var + eps)
        shift = beta - r_mean * scale
    elif norm == 'none':
        scale = jnp.ones((cout,), jnp.float32)
        shift = jnp.zeros((cout,), jnp.float32)
    else:
        raise NotImplementedError('invalid normalization function: {:s}'.format(norm))
    return {'w': w, 'scale': scale, 'shift': shift}


# --------------------------- pure-JAX reference ------------------------------

def ref_res_ffc3d(x, params, *, actv='relu'):
    actv_fn = make_actv(actv)
    xf = jnp.fft.fftshift(jnp.fft.fftn(x, axes=(-3, -2, -1), norm='ortho'),
                          axes=(-3, -2, -1))
    xcat = jnp.concatenate([jnp.real(xf), jnp.imag(xf)], axis=1)
    y = jnp.einsum('oc,bcdhw->bodhw', params['w'], xcat, precision='highest')
    y = (y * params['scale'][None, :, None, None, None]
         + params['shift'][None, :, None, None, None])
    y = actv_fn(y)
    c_half = y.shape[1] // 2
    yc = lax.complex(y[:, :c_half], y[:, c_half:])
    dx = jnp.fft.ifftn(jnp.fft.ifftshift(yc, axes=(-3, -2, -1)),
                       axes=(-3, -2, -1), norm='ortho')
    return x + dx


# ----------------------------------- main ------------------------------------

if __name__ == "__main__":
    key = jax.random.PRNGKey(0)
    kr, ki, kp = jax.random.split(key, 3)

    # ResFFC3d(plane=16, bottleneck=False, norm='batch', actv='relu', pe=False)
    # complex input (bs, plane, D, H, W)
    bs, plane, D, H, W = 2, 16, 8, 16, 16
    x = lax.complex(jax.random.normal(kr, (bs, plane, D, H, W), jnp.float32),
                    jax.random.normal(ki, (bs, plane, D, H, W), jnp.float32))
    params = init_res_ffc3d(kp, plane, norm='batch')

    fwd = jax.jit(res_ffc3d_forward)
    out = jax.block_until_ready(fwd(x, params))
    ref = ref_res_ffc3d(x, params)

    assert out.shape == x.shape, out.shape
    # Tolerance accounts for the bf16 cast of the Fourier-domain inputs/weights
    # (accumulation and post-matmul math are f32); measured max error ~3e-3.
    assert jnp.allclose(out.real, ref.real, atol=1e-2, rtol=1e-2), \
        float(jnp.max(jnp.abs(out.real - ref.real)))
    assert jnp.allclose(out.imag, ref.imag, atol=1e-2, rtol=1e-2), \
        float(jnp.max(jnp.abs(out.imag - ref.imag)))

    print("KERNEL_OK")
</pallas_src>

<mosaic_0001>
module attributes {stable_mosaic.version = 11 : i64} {
  func.func @_ffc_pointwise_kernel(%arg0: i32, %arg1: i32, %arg2: memref<1x32x1024xbf16, #tpu.memory_space<vmem>>, %arg3: memref<16x32xbf16, #tpu.memory_space<vmem>>, %arg4: memref<16x32xbf16, #tpu.memory_space<vmem>>, %arg5: memref<16x1xf32, #tpu.memory_space<vmem>>, %arg6: memref<16x1xf32, #tpu.memory_space<vmem>>, %arg7: memref<1x16x1024xf32, #tpu.memory_space<vmem>>, %arg8: memref<1x16x1024xf32, #tpu.memory_space<vmem>>) attributes {dimension_semantics = [#tpu.dimension_semantics<parallel>, #tpu.dimension_semantics<parallel>], iteration_bounds = array<i64: 2, 2>, scalar_prefetch = 0 : i64, scratch_operands = 0 : i64, tpu.core_type = #tpu.core_type<tc>, window_params = [{transform_indices = @transform_0, window_bounds = array<i64: 1, 32, 1024>}, {pipeline_mode = #tpu.pipeline_mode<synchronous>, transform_indices = @transform_1, window_bounds = array<i64: 16, 32>}, {pipeline_mode = #tpu.pipeline_mode<synchronous>, transform_indices = @transform_2, window_bounds = array<i64: 16, 32>}, {pipeline_mode = #tpu.pipeline_mode<synchronous>, transform_indices = @transform_3, window_bounds = array<i64: 16, 1>}, {pipeline_mode = #tpu.pipeline_mode<synchronous>, transform_indices = @transform_4, window_bounds = array<i64: 16, 1>}, {transform_indices = @transform_5, window_bounds = array<i64: 1, 16, 1024>}, {transform_indices = @transform_6, window_bounds = array<i64: 1, 16, 1024>}]} {
    %c0 = arith.constant 0 : index
    %c0_0 = arith.constant 0 : index
    %c0_1 = arith.constant 0 : index
    %0 = vector.load %arg2[%c0, %c0_0, %c0_1] : memref<1x32x1024xbf16, #tpu.memory_space<vmem>>, vector<1x32x1024xbf16>
    %1 = vector.shape_cast %0 : vector<1x32x1024xbf16> to vector<32x1024xbf16>
    %c0_2 = arith.constant 0 : index
    %c0_3 = arith.constant 0 : index
    %2 = vector.load %arg3[%c0_2, %c0_3] : memref<16x32xbf16, #tpu.memory_space<vmem>>, vector<16x32xbf16>
    %cst = arith.constant dense<0.000000e+00> : vector<16x1024xf32>
    %3 = tpu.matmul %2, %1, %cst {dimension_numbers = #tpu.dot_dimension_numbers<[1], [0], [0], [1], [0, 0, 1, 1], [], []>} : vector<16x32xbf16>, vector<32x1024xbf16>, vector<16x1024xf32> -> vector<16x1024xf32>
    %c0_4 = arith.constant 0 : index
    %c0_5 = arith.constant 0 : index
    %4 = vector.load %arg5[%c0_4, %c0_5] : memref<16x1xf32, #tpu.memory_space<vmem>>, vector<16x1xf32>
    %5 = vector.broadcast %4 : vector<16x1xf32> to vector<16x1024xf32>
    %6 = arith.addf %3, %5 : vector<16x1024xf32>
    %cst_6 = arith.constant 0.000000e+00 : f32
    %7 = vector.broadcast %cst_6 : f32 to vector<16x1024xf32>
    %8 = arith.maximumf %6, %7 : vector<16x1024xf32>
    %c0_7 = arith.constant 0 : index
    %c0_8 = arith.constant 0 : index
    %c0_9 = arith.constant 0 : index
    %9 = vector.load %arg7[%c0_7, %c0_8, %c0_9] : memref<1x16x1024xf32, #tpu.memory_space<vmem>>, vector<1x16x1024xf32>
    %10 = vector.shape_cast %9 : vector<1x16x1024xf32> to vector<16x1024xf32>
    %11 = vector.shape_cast %8 : vector<16x1024xf32> to vector<1x16x1024xf32>
    tpu.vector_store %arg7[%c0_7, %c0_8, %c0_9], %11 {strides = array<i32>} : memref<1x16x1024xf32, #tpu.memory_space<vmem>>, vector<1x16x1024xf32>,
    %c0_10 = arith.constant 0 : index
    %c0_11 = arith.constant 0 : index
    %12 = vector.load %arg4[%c0_10, %c0_11] : memref<16x32xbf16, #tpu.memory_space<vmem>>, vector<16x32xbf16>
    %cst_12 = arith.constant dense<0.000000e+00> : vector<16x1024xf32>
    %13 = tpu.matmul %12, %1, %cst_12 {dimension_numbers = #tpu.dot_dimension_numbers<[1], [0], [0], [1], [0, 0, 1, 1], [], []>} : vector<16x32xbf16>, vector<32x1024xbf16>, vector<16x1024xf32> -> vector<16x1024xf32>
    %c0_13 = arith.constant 0 : index
    %c0_14 = arith.constant 0 : index
    %14 = vector.load %arg6[%c0_13, %c0_14] : memref<16x1xf32, #tpu.memory_space<vmem>>, vector<16x1xf32>
    %15 = vector.broadcast %14 : vector<16x1xf32> to vector<16x1024xf32>
    %16 = arith.addf %13, %15 : vector<16x1024xf32>
    %cst_15 = arith.constant 0.000000e+00 : f32
    %17 = vector.broadcast %cst_15 : f32 to vector<16x1024xf32>
    %18 = arith.maximumf %16, %17 : vector<16x1024xf32>
    %c0_16 = arith.constant 0 : index
    %c0_17 = arith.constant 0 : index
    %c0_18 = arith.constant 0 : index
    %19 = vector.load %arg8[%c0_16, %c0_17, %c0_18] : memref<1x16x1024xf32, #tpu.memory_space<vmem>>, vector<1x16x1024xf32>
    %20 = vector.shape_cast %19 : vector<1x16x1024xf32> to vector<16x1024xf32>
    %21 = vector.shape_cast %18 : vector<16x1024xf32> to vector<1x16x1024xf32>
    tpu.vector_store %arg8[%c0_16, %c0_17, %c0_18], %21 {strides = array<i32>} : memref<1x16x1024xf32, #tpu.memory_space<vmem>>, vector<1x16x1024xf32>,
    return
  }
  func.func @transform_0(%arg0: i32, %arg1: i32) -> (i32, i32, i32) {
    %c0_i32 = arith.constant 0 : i32
    %c0_i32_0 = arith.constant 0 : i32
    return %arg0, %c0_i32, %arg1 : i32, i32, i32
  }
  func.func @transform_1(%arg0: i32, %arg1: i32) -> (i32, i32) {
    %c0_i32 = arith.constant 0 : i32
    %c0_i32_0 = arith.constant 0 : i32
    %c0_i32_1 = arith.constant 0 : i32
    return %c0_i32, %c0_i32_0 : i32, i32
  }
  func.func @transform_2(%arg0: i32, %arg1: i32) -> (i32, i32) {
    %c0_i32 = arith.constant 0 : i32
    %c0_i32_0 = arith.constant 0 : i32
    %c0_i32_1 = arith.constant 0 : i32
    return %c0_i32, %c0_i32_0 : i32, i32
  }
  func.func @transform_3(%arg0: i32, %arg1: i32) -> (i32, i32) {
    %c0_i32 = arith.constant 0 : i32
    %c0_i32_0 = arith.constant 0 : i32
    %c0_i32_1 = arith.constant 0 : i32
    return %c0_i32, %c0_i32_0 : i32, i32
  }
  func.func @transform_4(%arg0: i32, %arg1: i32) -> (i32, i32) {
    %c0_i32 = arith.constant 0 : i32
    %c0_i32_0 = arith.constant 0 : i32
    %c0_i32_1 = arith.constant 0 : i32
    return %c0_i32, %c0_i32_0 : i32, i32
  }
  func.func @transform_5(%arg0: i32, %arg1: i32) -> (i32, i32, i32) {
    %c0_i32 = arith.constant 0 : i32
    %c0_i32_0 = arith.constant 0 : i32
    return %arg0, %c0_i32, %arg1 : i32, i32, i32
  }
  func.func @transform_6(%arg0: i32, %arg1: i32) -> (i32, i32, i32) {
    %c0_i32 = arith.constant 0 : i32
    %c0_i32_0 = arith.constant 0 : i32
    return %arg0, %c0_i32, %arg1 : i32, i32, i32
  }
}

</mosaic_0001>

<bundles_post_ra>
// kernel: custom-call
= control target key start
LH: loop header
LB: loop body
LE: loop exit
PB: predicated region body
PF: predicated region fallthrough
CT: control target
= control target key end

     0   :  { %2 = vsyncpa [#allocation0], 0  ;;  %s47_s0 = inlined_call_operand.hbm [shape: c64[2,16,8,16,16], index: 0, kind: input, shape index: {}]   ;;  %s48_s1 = inlined_call_operand.vmem [shape: f32[2,16,8,16,16], index: 1, kind: output, shape index: {}]  }
   0x1   :  { %s3_s8 = sshll.u32 %s48_s1, 4  ;;  %s4_s8 = int_to_ptr.vmem [resolvable:$true] %s3_s8 }
   0x2   :  { %s17_s9 = scalar_lea.vmem %s4_s8, 65536  ;;  %p22_p1 = scmp.lt.s32.totalorder %s4_s8, %s4_s8 }
   0x3   :  { %p18_p0 = scmp.ne.s32.totalorder %s4_s8, %s17_s9  ;;  %p23_p2 = scmp.lt.s32.totalorder %s17_s9, %s17_s9 }
   0x5   :  { %p24_p3 = por %p23_p2, %p22_p1 }
   0x7   :  { %p25_p4 = pnand %p24_p3, %p18_p0 }
   0x9   :  { %28 = shalt.err (!%p25_p4)  }
   0xa   :  { %6 = dma.hbm_to_vmem [thread:$0]  %s47_s0, 65536, %s4_s8, [#allocation0] }
   0xb   :  { %29 = dma.done.wait [#allocation0], 65536  }
   0xc   :  { %30 = vsyncadd [#allocation0], 4294901760 }
   0xd   :  { %8 = vsyncpa [#allocation0], 1 }

// kernel: custom-call.1
= control target key start
LH: loop header
LB: loop body
LE: loop exit
PB: predicated region body
PF: predicated region fallthrough
CT: control target
= control target key end

     0   :  { %s51_s0 = inlined_call_operand.hbm [shape: c64[2,16,8,16,16], index: 0, kind: input, shape index: {}]   ;;  %s52_s1 = inlined_call_operand.vmem [shape: f32[2,16,8,16,16], index: 1, kind: output, shape index: {}]  }
   0x1   :  { %s2_s8 = scalar_lea.hbm %s51_s0, 65536 }
   0x2   :  { %3 = vsyncpa [#allocation0], 0  ;;  %s4_s11 = sshll.u32 %s52_s1, 4  ;;  %s5_s11 = int_to_ptr.vmem [resolvable:$true] %s4_s11 }
   0x3   :  { %s20_s12 = scalar_lea.vmem %s5_s11, 65536  ;;  %p25_p1 = scmp.lt.s32.totalorder %s5_s11, %s5_s11 }
   0x4   :  { %p21_p0 = scmp.ne.s32.totalorder %s5_s11, %s20_s12  ;;  %p26_p2 = scmp.lt.s32.totalorder %s20_s12, %s20_s12 }
   0x6   :  { %p27_p3 = por %p26_p2, %p25_p1 }
   0x8   :  { %p28_p4 = pnand %p27_p3, %p21_p0 }
   0xa   :  { %31 = shalt.err (!%p28_p4)  }
   0xb   :  { %7 = dma.hbm_to_vmem [thread:$0]  %s2_s8, 65536, %s5_s11, [#allocation0] }
   0xc   :  { %33 = dma.done.wait [#allocation0], 65536  }
   0xd   :  { %34 = vsyncadd [#allocation0], 4294901760 }
   0xe   :  { %9 = vsyncpa [#allocation0], 1 }

// kernel: res_ffc3d_forward.1
= control target key start
LH: loop header
LB: loop body
LE: loop exit
PB: predicated region body
PF: predicated region fallthrough
CT: control target
= control target key end

     0   :  { %s1300_s21 = smov 0   ;;  %s1302_s22 = smov 0   ;;  %s1558_s0 = inlined_call_operand.vmem [shape: bf16[2,32,2048], index: 0, kind: input, shape index: {}]   ;;  %s1559_s1 = inlined_call_operand.vmem [shape: bf16[16,32], index: 1, kind: input, shape index: {}]   ;;  %s1560_s2 = inlined_call_operand.vmem [shape: bf16[16,32], index: 2, kind: input, shape index: {}]   ;;  %s1561_s3 = inlined_call_operand.vmem [shape: f32[16,1], index: 3, kind: input, shape index: {}]   ;;  %s1562_s4 = inlined_call_operand.vmem [shape: f32[16,1], index: 4, kind: input, shape index: {}]   ;;  %s1563_s5 = inlined_call_operand.vmem [shape: f32[2,16,2048], index: 5, kind: output, shape index: {0}]   ;;  %s1564_s6 = inlined_call_operand.vmem [shape: f32[2,16,2048], index: 6, kind: output, shape index: {1}]  }
   0x1   :  { %s1304_s23 = smov 0   ;;  %s1306_s24 = smov 0  }
   0x2   :  { %s1308_s25 = smov 0   ;;  %s1310_s26 = smov 0  }
   0x3   :  { %s1312_s27 = smov 0  }
   0x4 LB: > { %s26_s28 = sadd.s32 1, %s1254_s25  ;;  %s29_s29 = sadd.s32 1, %s1258_s26  ;;  %s1262_s27 = sphi %s1312_s27, %s17_s27   ;;  %s1258_s26 = sphi %s1310_s26, %s1571_s26   ;;  %s1254_s25 = sphi %s1308_s25, %s1570_s25   ;;  %s1250_s24 = sphi %s1306_s24, %s1569_s24   ;;  %s1246_s23 = sphi %s1304_s23, %s1568_s23   ;;  %s1242_s22 = sphi %s1302_s22, %s1567_s22   ;;  %s1238_s21 = sphi %s1300_s21, %s1566_s21  }
   0x5   : > { %p27_p0 = scmp.ge.s32.totalorder %s26_s28, 2  ;;  %s1099_s30 = sadd.s32 4294967295, %s1262_s27  }
   0x6   : > { %p45_p1 = scmp.ne.s32.totalorder %s1242_s22, %s1238_s21  ;;  %p46_p2 = scmp.eq.s32.totalorder %s1262_s27, 0 }
   0x7   : > { %s1573_s28 = smov (%p27_p0, %s26_s28), 0  ;;  %s1575_s29 = smov (!%p27_p0, %s29_s29), %s1258_s26 }
   0x8   : > { %p31_p3 = scmp.ge.s32.totalorder %s1575_s29, 2  ;;  %p161_p4 = scmp.eq.s32.totalorder %s1099_s30, 3 }
   0x9   : > { %s34_s7 = ssub.s32 %s1254_s25, %s1573_s28  ;;  %p47_p5 = por %p46_p2, %p45_p1 }
   0xa   : > { %s1577_s29 = smov (%p31_p3, %s1575_s29), 0  ;;  %p1348_p6 = por %p161_p4, %p45_p1 }
   0xb   : > { %s33_s9 = ssub.s32 %s1258_s26, %s1577_s29  ;;  %s38_s11 = sadd.s32 1, %s1242_s22 }
   0xc   : > { %s35_s10 = sor.u32 %s34_s7, %s33_s9  ;;  %p1102_p8 = scmp.ge.s32.totalorder %s1262_s27, 4 }
   0xd   : > { %p36_p7 = scmp.eq.s32.totalorder %s35_s10, 0 }
   0xe   : > { %223 = sbr.rel (%p1102_p8) target bundleno = 34 (0x22), region = 32 }
   0xf   : > { %s1356_s12 = scalar_select %p36_p7, %s1242_s22, %s38_s11  }
  0x13   : > { %226 = sbr.rel (!%p47_p5) target bundleno = 34 (0x22), region = 36  ;;  %s228_s13 = sand.u32 (%p47_p5), 1, %s1242_s22  }
  0x14   : > { %s1104_s14 = sshll.u32 (%p47_p5), %s1254_s25, 3  ;;  %s1103_s15 = sshll.u32 (%p47_p5), %s228_s13, 7 }
  0x15   : > { %s1105_s16 = sshll.u32 (%p47_p5), %s1258_s26, 6  ;;  %s230_s7 = scalar_lea.vmem (%p47_p5), [#allocation2], %s1103_s15 }
  0x16   : > { %s233_s17 = sadd.s32 (%p47_p5), %s1105_s16, %s1104_s14 }
  0x17   : > { %s1106_s18 = sshll.u32 (%p47_p5), %s233_s17, 2 }
  0x18   : > { %s1365_s30 = scalar_lea.vmem %s1558_s0, %s1106_s18 }
  0x19   : > { %v248_v0 = vld [vmem:[%s1365_s30] sm:$0xff]  ;;  %v250_v1 = vld [vmem:[%s1365_s30 + $0x8] sm:$0xff]  ;;  %v252_v2 = vld [vmem:[%s1365_s30 + $0x10] sm:$0xff] }
  0x1a   : > { %249 = vst [vmem:[%s230_s7] sm:$0xff] %v248_v0  ;;  %251 = vst [vmem:[%s230_s7 + $0x8] sm:$0xff] %v250_v1  ;;  %v254_v3 = vld [vmem:[%s1365_s30 + $0x18] sm:$0xff]  ;;  %v256_v4 = vld [vmem:[%s1365_s30 + $0x40] sm:$0xff] }
  0x1b   : > { %253 = vst [vmem:[%s230_s7 + $0x10] sm:$0xff] %v252_v2  ;;  %v258_v5 = vld [vmem:[%s1365_s30 + $0x48] sm:$0xff]  ;;  %255 = vst [vmem:[%s230_s7 + $0x18] sm:$0xff] %v254_v3  ;;  %v260_v6 = vld [vmem:[%s1365_s30 + $0x50] sm:$0xff] }
  0x1c   : > { %257 = vst [vmem:[%s230_s7 + $0x20] sm:$0xff] %v256_v4  ;;  %259 = vst [vmem:[%s230_s7 + $0x28] sm:$0xff] %v258_v5  ;;  %v262_v7 = vld [vmem:[%s1365_s30 + $0x58] sm:$0xff]  ;;  %v264_v8 = vld [vmem:[%s1365_s30 + $0x80] sm:$0xff] }
  0x1d   : > { %261 = vst [vmem:[%s230_s7 + $0x30] sm:$0xff] %v260_v6  ;;  %263 = vst [vmem:[%s230_s7 + $0x38] sm:$0xff] %v262_v7  ;;  %v266_v9 = vld [vmem:[%s1365_s30 + $0x88] sm:$0xff]  ;;  %v268_v10 = vld [vmem:[%s1365_s30 + $0x90] sm:$0xff] }
  0x1e   : > { %265 = vst [vmem:[%s230_s7 + $0x40] sm:$0xff] %v264_v8  ;;  %v270_v11 = vld [vmem:[%s1365_s30 + $0x98] sm:$0xff]  ;;  %267 = vst [vmem:[%s230_s7 + $0x48] sm:$0xff] %v266_v9  ;;  %v272_v12 = vld [vmem:[%s1365_s30 + $0xc0] sm:$0xff] }
  0x1f   : > { %269 = vst [vmem:[%s230_s7 + $0x50] sm:$0xff] %v268_v10  ;;  %271 = vst [vmem:[%s230_s7 + $0x58] sm:$0xff] %v270_v11  ;;  %v274_v13 = vld [vmem:[%s1365_s30 + $0xc8] sm:$0xff]  ;;  %v276_v14 = vld [vmem:[%s1365_s30 + $0xd0] sm:$0xff] }
  0x20   : > { %273 = vst [vmem:[%s230_s7 + $0x60] sm:$0xff] %v272_v12  ;;  %275 = vst [vmem:[%s230_s7 + $0x68] sm:$0xff] %v274_v13  ;;  %v278_v15 = vld [vmem:[%s1365_s30 + $0xd8] sm:$0xff] }
  0x21   : > { %277 = vst [vmem:[%s230_s7 + $0x70] sm:$0xff] %v276_v14  ;;  %279 = vst [vmem:[%s230_s7 + $0x78] sm:$0xff] %v278_v15 }
  0x22 PF: > { %p1107_p9 = scmp.ge.s32.totalorder %s1262_s27, 1  ;;  %p284_p10 = scmp.lt.s32.totalorder %s1262_s27, 5 }
  0x24   : > { %p285_p11 = pnand %p1107_p9, %p284_p10 }
  0x25   : > { %s291_s9 = sand.u32 (!%p285_p11), 1, %s1238_s21  }
  0x26   : > { %288 = sbr.rel (%p285_p11) target bundleno = 297 (0x129), region = 59  ;;  %s1386_s10 = sshll.u32 (!%p285_p11), %s291_s9, 7 }
  0x27   : > { %s1396_s14 = scalar_lea.vmem (!%p285_p11), [#allocation2], %s1386_s10  ;;  %s1444_s11 = scalar_lea.vmem (!%p285_p11), [#allocation3], %s1386_s10 }
  0x28   : > { %s1469_s13 = scalar_lea.vmem (!%p285_p11), [#allocation4], %s1386_s10 }
  0x2b   : > { %v1264_v16 = vmov 0   ;;  %v345_v17 = vld [vmem:[%s1561_s3] sm:$0xff]  ;;  %v336_v20 = vld [vmem:[%s1396_s14 + $0x48] sm:$0xff]  ;;  %v337_v32 = vld [vmem:[%s1396_s14 + $0x50] sm:$0xff]  ;;  %vm442_vm0 = vcmask 261120   ;;  %s1139_s10 = sshll.u32 (%p1348_p6), %s1246_s23, 3 }
  0x2c   : > { %478 = vmatprep.mubr.bf16.mxu0 %v1264_v16  ;;  %521 = vmatprep.mubr.bf16.mxu1 %v1264_v16  ;;  %v335_v18 = vld [vmem:[%s1396_s14 + $0x40] sm:$0xff]  ;;  %v340_v22 = vld [vmem:[%s1396_s14 + $0x68] sm:$0xff]  ;;  %v341_v34 = vld [vmem:[%s1396_s14 + $0x70] sm:$0xff] }
  0x2d   : > { %1204 = vset.pattern.permute.xlu0 %v1264_v16  ;;  %1205 = vset.pattern.permute.xlu1 %v1264_v16  ;;  %v339_v19 = vld [vmem:[%s1396_s14 + $0x60] sm:$0xff]  ;;  %v346_v26 = vld [vmem:[%s1561_s3 + $0x8] sm:$0xff]  ;;  %v1123_v27 = vcombine.high %v336_v20, %v340_v22  ;;  %v1122_v28 = vcombine.low %v336_v20, %v340_v22  ;;  %v338_v35 = vld [vmem:[%s1396_s14 + $0x58] sm:$0xff]  ;;  %v1125_v39 = vcombine.high %v337_v32, %v341_v34 }
  0x2e   : > { %349 = vperm.xlu0 %1204, %v345_v17   ;;  %v1121_v21 = vcombine.high %v335_v18, %v339_v19  ;;  %v1120_v23 = vcombine.low %v335_v18, %v339_v19  ;;  %v327_v24 = vld [vmem:[%s1396_s14] sm:$0xff]  ;;  %v328_v30 = vld [vmem:[%s1396_s14 + $0x8] sm:$0xff]  ;;  %v342_v36 = vld [vmem:[%s1396_s14 + $0x78] sm:$0xff]  ;;  %v1124_v47 = vcombine.low %v337_v32, %v341_v34 }
  0x2f   : > { %v331_v25 = vld [vmem:[%s1396_s14 + $0x20] sm:$0xff]  ;;  %v332_v31 = vld [vmem:[%s1396_s14 + $0x28] sm:$0xff]  ;;  %501 = vmatprep.subr.bf16.mxu1 %v1123_v27  ;;  %v1127_v41 = vcombine.high %v338_v35, %v342_v36  ;;  %v329_v42 = vld [vmem:[%s1396_s14 + $0x10] sm:$0xff]  ;;  %v1126_v49 = vcombine.low %v338_v35, %v342_v36 }
  0x30   : > { %v1113_v29 = vcombine.high %v327_v24, %v331_v25  ;;  %458 = vmatprep.subr.bf16.mxu0 %v1121_v21  ;;  %v1115_v33 = vcombine.high %v328_v30, %v332_v31  ;;  %v1112_v37 = vcombine.low %v327_v24, %v331_v25  ;;  %502 = vmatpush1.bf16.msra.mxu1 %v1122_v28  ;;  %v652_v40 = vld [vmem:[%s1562_s4] sm:$0xff]  ;;  %v333_v43 = vld [vmem:[%s1396_s14 + $0x30] sm:$0xff]  ;;  %v330_v45 = vld [vmem:[%s1396_s14 + $0x18] sm:$0xff] }
  0x31   : > { %459 = vmatpush1.bf16.msra.mxu0 %v1120_v23  ;;  %v1114_v38 = vcombine.low %v328_v30, %v332_v31  ;;  %v1206_v44 = vld [vmem:[%s1559_s1] sm:$0xff]   ;;  %v334_v46 = vld [vmem:[%s1396_s14 + $0x38] sm:$0xff]  ;;  %656 = vperm.xlu1 %1205, %v652_v40   ;;  %v653_v48 = vld [vmem:[%s1562_s4 + $0x8] sm:$0xff]  ;;  %v1117_v50 = vcombine.high %v329_v42, %v333_v43  ;;  %v1116_v52 = vcombine.low %v329_v42, %v333_v43  ;;  %s1140_s14 = sshll.u32 (%p1348_p6), %s1250_s24, 5 }
  0x32   : > { %460 = vmatprep.subr.bf16.mxu0 %v1113_v29  ;;  %503 = vmatprep.subr.bf16.mxu1 %v1115_v33  ;;  %v1119_v51 = vcombine.high %v330_v45, %v334_v46  ;;  %v1118_v53 = vcombine.low %v330_v45, %v334_v46  ;;  %v1207_v54 = vld [vmem:[%s1560_s2] sm:$0xff]   ;;  %s889_s21 = sadd.s32 (%p1348_p6), %s1140_s14, %s1139_s10 }
  0x33   : > { %354 = vperm.xlu0 %1204, %v346_v26   ;;  %s1141_s15 = sshll.u32 (%p1348_p6), %s889_s21, 3 }
  0x34   : > { %504 = vmatpush1.bf16.msra.mxu1 %v1114_v38  ;;  %s891_s18 = scalar_lea.vmem (%p1348_p6), %s1563_s5, %s1141_s15 }
  0x35   : > { %461 = vmatpush1.bf16.msra.mxu0 %v1112_v37  ;;  %587 = vmatprep.subr.bf16.mxu1 %v1127_v41 }
  0x36   : > { %544 = vmatprep.subr.bf16.mxu0 %v1125_v39  ;;  %661 = vperm.xlu1 %1205, %v653_v48  }
  0x37   : > { %1129 = vmatmul.mubr.msk.bf16.vlgmr.msra.gmra.mxu1 %vm442_vm0, %v1206_v44 }
  0x38   : > { %1128 = vmatmul.mubr.msk.bf16.vlgmr.msra.gmra.mxu0 %vm442_vm0, %v1206_v44  ;;  %588 = vmatpush1.bf16.msra.mxu1 %v1126_v49 }
  0x39   : > { %545 = vmatpush1.bf16.msra.mxu0 %v1124_v47  ;;  %589 = vmatprep.subr.bf16.mxu1 %v1119_v51 }
  0x3a   : > { %546 = vmatprep.subr.bf16.mxu0 %v1117_v50  ;;  %564 = vmatprep.mubr.bf16.mxu0 %v1264_v16 }
  0x3b   : > { %607 = vmatprep.mubr.bf16.mxu1 %v1264_v16 }
  0x3c   : > { %590 = vmatpush1.bf16.msra.mxu1 %v1118_v53 }
  0x3d   : > { %547 = vmatpush1.bf16.msra.mxu0 %v1116_v52  ;;  %727 = vmatprep.subr.bf16.mxu1 %v1123_v27 }
  0x3e   : > { %684 = vmatprep.subr.bf16.mxu0 %v1121_v21 }
  0x3f   : > { %1131 = vmatmul.mubr.msk.bf16.vlgmr.msra.gmra.mxu1 %vm442_vm0, %v1206_v44 }
  0x40   : > { %1130 = vmatmul.mubr.msk.bf16.vlgmr.msra.gmra.mxu0 %vm442_vm0, %v1206_v44  ;;  %728 = vmatpush1.bf16.msra.mxu1 %v1122_v28 }
  0x41   : > { %685 = vmatpush1.bf16.msra.mxu0 %v1120_v23  ;;  %729 = vmatprep.subr.bf16.mxu1 %v1115_v33 }
  0x42   : > { %686 = vmatprep.subr.bf16.mxu0 %v1113_v29  ;;  %704 = vmatprep.mubr.bf16.mxu0 %v1264_v16 }
  0x43   : > { %747 = vmatprep.mubr.bf16.mxu1 %v1264_v16 }
  0x44   : > { %730 = vmatpush1.bf16.msra.mxu1 %v1114_v38 }
  0x45   : > { %687 = vmatpush1.bf16.msra.mxu0 %v1112_v37  ;;  %813 = vmatprep.subr.bf16.mxu1 %v1127_v41 }
  0x46   : > { %770 = vmatprep.subr.bf16.mxu0 %v1125_v39 }
  0x47   : > { %1134 = vmatmul.mubr.msk.bf16.vlgmr.msra.gmra.mxu1 %vm442_vm0, %v1207_v54 }
  0x48   : > { %1133 = vmatmul.mubr.msk.bf16.vlgmr.msra.gmra.mxu0 %vm442_vm0, %v1207_v54  ;;  %814 = vmatpush1.bf16.msra.mxu1 %v1126_v49 }
  0x49   : > { %771 = vmatpush1.bf16.msra.mxu0 %v1124_v47  ;;  %815 = vmatprep.subr.bf16.mxu1 %v1119_v51 }
  0x4a   : > { %772 = vmatprep.subr.bf16.mxu0 %v1117_v50  ;;  %790 = vmatprep.mubr.bf16.mxu0 %v1264_v16 }
  0x4b   : > { %833 = vmatprep.mubr.bf16.mxu1 %v1264_v16 }
  0x4c   : > { %816 = vmatpush1.bf16.msra.mxu1 %v1118_v53 }
  0x4d   : > { %773 = vmatpush1.bf16.msra.mxu0 %v1116_v52 }
  0x4f   : > { %1136 = vmatmul.mubr.msk.bf16.vlgmr.msra.gmra.mxu1 %vm442_vm0, %v1207_v54 }
  0x50   : > { %1135 = vmatmul.mubr.msk.bf16.vlgmr.msra.gmra.mxu0 %vm442_vm0, %v1207_v54 }
  0xa9   : > { %v350_v55 = vpop.permute.xlu0 %349 }
  0xac   : > { %v1454_v28 = vpop.permute.xlu1 %656 }
  0xae   : > { %v355_v61 = vpop.permute.xlu0 %354 }
  0xb1   : > { %v662_v47 = vpop.permute.xlu1 %661 }
  0xf7   : > { %v523_v58 = vpop.f32.mrf.mxu1 }
  0xf8   : > { %v480_v56 = vpop.f32.mrf.mxu0  ;;  %v524_v59 = vadd.f32 %v523_v58, %v350_v55 }
  0xf9   : > { %v481_v57 = vadd.f32 %v480_v56, %v350_v55  ;;  %v525_v0 = vpop.f32.mrf.mxu1 }
  0xfa   : > { %v482_v60 = vpop.f32.mrf.mxu0  ;;  %v620_v1 = vmax.f32 %v524_v59, 0.0  ;;  %v526_v2 = vadd.f32 %v525_v0, %v350_v55 }
  0xfb   : > { %v618_v62 = vmax.f32 %v481_v57, 0.0  ;;  %v483_v63 = vadd.f32 %v482_v60, %v350_v55  ;;  %v527_v6 = vpop.f32.mrf.mxu1 }
  0xfc   : > { %v484_v3 = vpop.f32.mrf.mxu0  ;;  %636 = vst [vmem:[%s1444_s11 + $0x10] sm:$0xff] %v620_v1  ;;  %v621_v7 = vmax.f32 %v526_v2, 0.0  ;;  %v528_v8 = vadd.f32 %v527_v6, %v355_v61 }
  0xfd   : > { %634 = vst [vmem:[%s1444_s11] sm:$0xff] %v618_v62  ;;  %v619_v4 = vmax.f32 %v483_v63, 0.0  ;;  %v485_v5 = vadd.f32 %v484_v3, %v355_v61  ;;  %v529_v12 = vpop.f32.mrf.mxu1 }
  0xfe   : > { %v486_v9 = vpop.f32.mrf.mxu0  ;;  %637 = vst [vmem:[%s1444_s11 + $0x18] sm:$0xff] %v621_v7  ;;  %v628_v13 = vmax.f32 %v528_v8, 0.0  ;;  %v530_v14 = vadd.f32 %v529_v12, %v355_v61 }
  0xff   : > { %635 = vst [vmem:[%s1444_s11 + $0x8] sm:$0xff] %v619_v4  ;;  %v626_v10 = vmax.f32 %v485_v5, 0.0  ;;  %v487_v11 = vadd.f32 %v486_v9, %v355_v61  ;;  %v609_v18 = vpop.f32.mrf.mxu1 }
 0x100   : > { %v566_v15 = vpop.f32.mrf.mxu0  ;;  %644 = vst [vmem:[%s1444_s11 + $0x50] sm:$0xff] %v628_v13  ;;  %v629_v19 = vmax.f32 %v530_v14, 0.0  ;;  %v610_v20 = vadd.f32 %v609_v18, %v350_v55 }
 0x101   : > { %642 = vst [vmem:[%s1444_s11 + $0x40] sm:$0xff] %v626_v10  ;;  %v627_v16 = vmax.f32 %v487_v11, 0.0  ;;  %v567_v17 = vadd.f32 %v566_v15, %v350_v55  ;;  %v611_v24 = vpop.f32.mrf.mxu1 }
 0x102   : > { %v568_v21 = vpop.f32.mrf.mxu0  ;;  %645 = vst [vmem:[%s1444_s11 + $0x58] sm:$0xff] %v629_v19  ;;  %v624_v25 = vmax.f32 %v610_v20, 0.0  ;;  %v612_v26 = vadd.f32 %v611_v24, %v350_v55 }
 0x103   : > { %643 = vst [vmem:[%s1444_s11 + $0x48] sm:$0xff] %v627_v16  ;;  %v622_v22 = vmax.f32 %v567_v17, 0.0  ;;  %v569_v23 = vadd.f32 %v568_v21, %v350_v55  ;;  %v613_v31 = vpop.f32.mrf.mxu1 }
 0x104   : > { %v570_v27 = vpop.f32.mrf.mxu0  ;;  %640 = vst [vmem:[%s1444_s11 + $0x30] sm:$0xff] %v624_v25  ;;  %v625_v32 = vmax.f32 %v612_v26, 0.0  ;;  %v614_v33 = vadd.f32 %v613_v31, %v355_v61 }
 0x105   : > { %638 = vst [vmem:[%s1444_s11 + $0x20] sm:$0xff] %v622_v22  ;;  %v623_v29 = vmax.f32 %v569_v23, 0.0  ;;  %v571_v30 = vadd.f32 %v570_v27, %v355_v61  ;;  %v615_v37 = vpop.f32.mrf.mxu1  ;;  %v904_v27 = vld [vmem:[%s1444_s11] sm:$0xff] (%p1348_p6) }
 0x106   : > { %v572_v34 = vpop.f32.mrf.mxu0  ;;  %641 = vst [vmem:[%s1444_s11 + $0x38] sm:$0xff] %v625_v32  ;;  %v632_v38 = vmax.f32 %v614_v33, 0.0  ;;  %v616_v39 = vadd.f32 %v615_v37, %v355_v61  ;;  %905 = vst [vmem:[%s891_s18] sm:$0xff] (%p1348_p6), %v904_v27 }
 0x107   : > { %639 = vst [vmem:[%s1444_s11 + $0x28] sm:$0xff] %v623_v29  ;;  %v630_v35 = vmax.f32 %v571_v30, 0.0  ;;  %v573_v36 = vadd.f32 %v572_v34, %v355_v61  ;;  %v749_v43 = vpop.f32.mrf.mxu1  ;;  %v908_v29 = vld [vmem:[%s1444_s11 + $0x10] sm:$0xff] (%p1348_p6)  ;;  %v910_v30 = vld [vmem:[%s1444_s11 + $0x18] sm:$0xff] (%p1348_p6) }
 0x108   : > { %v706_v40 = vpop.f32.mrf.mxu0  ;;  %648 = vst [vmem:[%s1444_s11 + $0x70] sm:$0xff] %v632_v38  ;;  %v633_v44 = vmax.f32 %v616_v39, 0.0  ;;  %v750_v45 = vadd.f32 %v749_v43, %v1454_v28  ;;  %v924_v37 = vld [vmem:[%s1444_s11 + $0x50] sm:$0xff] (%p1348_p6)  ;;  %909 = vst [vmem:[%s891_s18 + $0x10] sm:$0xff] (%p1348_p6), %v908_v29 }
 0x109   : > { %646 = vst [vmem:[%s1444_s11 + $0x60] sm:$0xff] %v630_v35  ;;  %v631_v41 = vmax.f32 %v573_v36, 0.0  ;;  %v707_v42 = vadd.f32 %v706_v40, %v1454_v28  ;;  %v751_v50 = vpop.f32.mrf.mxu1  ;;  %v920_v35 = vld [vmem:[%s1444_s11 + $0x40] sm:$0xff] (%p1348_p6)  ;;  %v926_v38 = vld [vmem:[%s1444_s11 + $0x58] sm:$0xff] (%p1348_p6)  ;;  %911 = vst [vmem:[%s891_s18 + $0x18] sm:$0xff] (%p1348_p6), %v910_v30 }
 0x10a   : > { %v708_v46 = vpop.f32.mrf.mxu0  ;;  %649 = vst [vmem:[%s1444_s11 + $0x78] sm:$0xff] %v633_v44  ;;  %v846_v51 = vmax.f32 %v750_v45, 0.0  ;;  %v752_v52 = vadd.f32 %v751_v50, %v1454_v28  ;;  %v922_v36 = vld [vmem:[%s1444_s11 + $0x48] sm:$0xff] (%p1348_p6)  ;;  %921 = vst [vmem:[%s891_s18 + $0x80] sm:$0xff] (%p1348_p6), %v920_v35 }
 0x10b   : > { %647 = vst [vmem:[%s1444_s11 + $0x68] sm:$0xff] %v631_v41  ;;  %v844_v48 = vmax.f32 %v707_v42, 0.0  ;;  %v709_v49 = vadd.f32 %v708_v46, %v1454_v28  ;;  %v753_v56 = vpop.f32.mrf.mxu1  ;;  %v916_v33 = vld [vmem:[%s1444_s11 + $0x30] sm:$0xff] (%p1348_p6)  ;;  %923 = vst [vmem:[%s891_s18 + $0x88] sm:$0xff] (%p1348_p6), %v922_v36 }
 0x10c   : > { %v710_v53 = vpop.f32.mrf.mxu0  ;;  %862 = vst [vmem:[%s1469_s13 + $0x10] sm:$0xff] %v846_v51  ;;  %v847_v57 = vmax.f32 %v752_v52, 0.0  ;;  %v754_v58 = vadd.f32 %v753_v56, %v662_v47  ;;  %v912_v31 = vld [vmem:[%s1444_s11 + $0x20] sm:$0xff] (%p1348_p6)  ;;  %917 = vst [vmem:[%s891_s18 + $0x30] sm:$0xff] (%p1348_p6), %v916_v33 }
 0x10d   : > { %860 = vst [vmem:[%s1469_s13] sm:$0xff] %v844_v48  ;;  %v845_v54 = vmax.f32 %v709_v49, 0.0  ;;  %v711_v55 = vadd.f32 %v710_v53, %v662_v47  ;;  %v755_v62 = vpop.f32.mrf.mxu1  ;;  %v918_v34 = vld [vmem:[%s1444_s11 + $0x38] sm:$0xff] (%p1348_p6)  ;;  %913 = vst [vmem:[%s891_s18 + $0x20] sm:$0xff] (%p1348_p6), %v912_v31 }
 0x10e   : > { %v712_v59 = vpop.f32.mrf.mxu0  ;;  %863 = vst [vmem:[%s1469_s13 + $0x18] sm:$0xff] %v847_v57  ;;  %v854_v63 = vmax.f32 %v754_v58, 0.0  ;;  %v756_v0 = vadd.f32 %v755_v62, %v662_v47  ;;  %v914_v32 = vld [vmem:[%s1444_s11 + $0x28] sm:$0xff] (%p1348_p6)  ;;  %919 = vst [vmem:[%s891_s18 + $0x38] sm:$0xff] (%p1348_p6), %v918_v34 }
 0x10f   : > { %861 = vst [vmem:[%s1469_s13 + $0x8] sm:$0xff] %v845_v54  ;;  %v852_v60 = vmax.f32 %v711_v55, 0.0  ;;  %v713_v61 = vadd.f32 %v712_v59, %v662_v47  ;;  %v835_v4 = vpop.f32.mrf.mxu1  ;;  %915 = vst [vmem:[%s891_s18 + $0x28] sm:$0xff] (%p1348_p6), %v914_v32  ;;  %v932_v41 = vld [vmem:[%s1444_s11 + $0x70] sm:$0xff] (%p1348_p6) }
 0x110   : > { %v792_v1 = vpop.f32.mrf.mxu0  ;;  %870 = vst [vmem:[%s1469_s13 + $0x50] sm:$0xff] %v854_v63  ;;  %v855_v5 = vmax.f32 %v756_v0, 0.0  ;;  %v836_v6 = vadd.f32 %v835_v4, %v1454_v28  ;;  %925 = vst [vmem:[%s891_s18 + $0x90] sm:$0xff] (%p1348_p6), %v924_v37  ;;  %v928_v39 = vld [vmem:[%s1444_s11 + $0x60] sm:$0xff] (%p1348_p6) }
 0x111   : > { %868 = vst [vmem:[%s1469_s13 + $0x40] sm:$0xff] %v852_v60  ;;  %v853_v2 = vmax.f32 %v713_v61, 0.0  ;;  %v793_v3 = vadd.f32 %v792_v1, %v1454_v28  ;;  %v837_v10 = vpop.f32.mrf.mxu1  ;;  %927 = vst [vmem:[%s891_s18 + $0x98] sm:$0xff] (%p1348_p6), %v926_v38  ;;  %v934_v42 = vld [vmem:[%s1444_s11 + $0x78] sm:$0xff] (%p1348_p6) }
 0x112   : > { %v794_v7 = vpop.f32.mrf.mxu0  ;;  %871 = vst [vmem:[%s1469_s13 + $0x58] sm:$0xff] %v855_v5  ;;  %v850_v11 = vmax.f32 %v836_v6, 0.0  ;;  %v838_v12 = vadd.f32 %v837_v10, %v1454_v28  ;;  %v930_v40 = vld [vmem:[%s1444_s11 + $0x68] sm:$0xff] (%p1348_p6)  ;;  %929 = vst [vmem:[%s891_s18 + $0xa0] sm:$0xff] (%p1348_p6), %v928_v39 }
 0x113   : > { %869 = vst [vmem:[%s1469_s13 + $0x48] sm:$0xff] %v853_v2  ;;  %v848_v8 = vmax.f32 %v793_v3, 0.0  ;;  %v795_v9 = vadd.f32 %v794_v7, %v1454_v28  ;;  %v839_v16 = vpop.f32.mrf.mxu1  ;;  %v906_v28 = vld [vmem:[%s1444_s11 + $0x8] sm:$0xff] (%p1348_p6)  ;;  %931 = vst [vmem:[%s891_s18 + $0xa8] sm:$0xff] (%p1348_p6), %v930_v40 }
 0x114   : > { %v796_v13 = vpop.f32.mrf.mxu0  ;;  %866 = vst [vmem:[%s1469_s13 + $0x30] sm:$0xff] %v850_v11  ;;  %v851_v17 = vmax.f32 %v838_v12, 0.0  ;;  %v840_v18 = vadd.f32 %v839_v16, %v662_v47  ;;  %907 = vst [vmem:[%s891_s18 + $0x8] sm:$0xff] (%p1348_p6), %v906_v28 }
 0x115   : > { %864 = vst [vmem:[%s1469_s13 + $0x20] sm:$0xff] %v848_v8  ;;  %v849_v14 = vmax.f32 %v795_v9, 0.0  ;;  %v797_v15 = vadd.f32 %v796_v13, %v662_v47  ;;  %v841_v22 = vpop.f32.mrf.mxu1  ;;  %933 = vst [vmem:[%s891_s18 + $0xb0] sm:$0xff] (%p1348_p6), %v932_v41 }
 0x116   : > { %v798_v19 = vpop.f32.mrf.mxu0  ;;  %867 = vst [vmem:[%s1469_s13 + $0x38] sm:$0xff] %v851_v17  ;;  %v858_v23 = vmax.f32 %v840_v18, 0.0  ;;  %v842_v24 = vadd.f32 %v841_v22, %v662_v47  ;;  %935 = vst [vmem:[%s891_s18 + $0xb8] sm:$0xff] (%p1348_p6), %v934_v42 }
 0x117   : > { %865 = vst [vmem:[%s1469_s13 + $0x28] sm:$0xff] %v849_v14  ;;  %v856_v20 = vmax.f32 %v797_v15, 0.0  ;;  %v799_v21 = vadd.f32 %v798_v19, %v662_v47  ;;  %886 = sbr.rel (!%p1348_p6) target bundleno = 284 (0x11c), region = 67 }
 0x118   : > { %874 = vst [vmem:[%s1469_s13 + $0x70] sm:$0xff] %v858_v23  ;;  %v859_v26 = vmax.f32 %v842_v24, 0.0 }
 0x119   : > { %872 = vst [vmem:[%s1469_s13 + $0x60] sm:$0xff] %v856_v20  ;;  %v857_v25 = vmax.f32 %v799_v21, 0.0 }
 0x11a   : > { %875 = vst [vmem:[%s1469_s13 + $0x78] sm:$0xff] %v859_v26 }
 0x11b   : > { %873 = vst [vmem:[%s1469_s13 + $0x68] sm:$0xff] %v857_v25 }
 0x11c PF: > { %941 = sbr.rel (!%p1348_p6) target bundleno = 297 (0x129), region = 90  ;;  %s1142_s19 = sshll.u32 (%p1348_p6), %s1246_s23, 3  ;;  %v959_v43 = vld [vmem:[%s1469_s13] sm:$0xff] (%p1348_p6)  ;;  %v961_v44 = vld [vmem:[%s1469_s13 + $0x8] sm:$0xff] (%p1348_p6)  ;;  %v963_v45 = vld [vmem:[%s1469_s13 + $0x10] sm:$0xff] (%p1348_p6) }
 0x11d   : > { %s1143_s20 = sshll.u32 (%p1348_p6), %s1250_s24, 5  ;;  %v965_v46 = vld [vmem:[%s1469_s13 + $0x18] sm:$0xff] (%p1348_p6)  ;;  %v967_v47 = vld [vmem:[%s1469_s13 + $0x20] sm:$0xff] (%p1348_p6)  ;;  %v971_v49 = vld [vmem:[%s1469_s13 + $0x30] sm:$0xff] (%p1348_p6) }
 0x11e   : > { %s944_s8 = sadd.s32 (%p1348_p6), %s1143_s20, %s1142_s19  ;;  %v969_v48 = vld [vmem:[%s1469_s13 + $0x28] sm:$0xff] (%p1348_p6)  ;;  %v973_v50 = vld [vmem:[%s1469_s13 + $0x38] sm:$0xff] (%p1348_p6)  ;;  %v975_v51 = vld [vmem:[%s1469_s13 + $0x40] sm:$0xff] (%p1348_p6) }
 0x11f   : > { %s1144_s30 = sshll.u32 (%p1348_p6), %s944_s8, 3  ;;  %v977_v52 = vld [vmem:[%s1469_s13 + $0x48] sm:$0xff] (%p1348_p6)  ;;  %v979_v53 = vld [vmem:[%s1469_s13 + $0x50] sm:$0xff] (%p1348_p6)  ;;  %v981_v54 = vld [vmem:[%s1469_s13 + $0x58] sm:$0xff] (%p1348_p6) }
 0x120   : > { %s946_s11 = scalar_lea.vmem (%p1348_p6), %s1564_s6, %s1144_s30  ;;  %v983_v55 = vld [vmem:[%s1469_s13 + $0x60] sm:$0xff] (%p1348_p6)  ;;  %v987_v57 = vld [vmem:[%s1469_s13 + $0x70] sm:$0xff] (%p1348_p6) }
 0x121   : > { %960 = vst [vmem:[%s946_s11] sm:$0xff] %v959_v43  ;;  %962 = vst [vmem:[%s946_s11 + $0x8] sm:$0xff] %v961_v44  ;;  %v989_v58 = vld [vmem:[%s1469_s13 + $0x78] sm:$0xff] }
 0x122   : > { %964 = vst [vmem:[%s946_s11 + $0x10] sm:$0xff] %v963_v45  ;;  %966 = vst [vmem:[%s946_s11 + $0x18] sm:$0xff] %v965_v46  ;;  %v985_v56 = vld [vmem:[%s1469_s13 + $0x68] sm:$0xff] }
 0x123   : > { %968 = vst [vmem:[%s946_s11 + $0x20] sm:$0xff] %v967_v47  ;;  %970 = vst [vmem:[%s946_s11 + $0x28] sm:$0xff] %v969_v48 }
 0x124   : > { %972 = vst [vmem:[%s946_s11 + $0x30] sm:$0xff] %v971_v49  ;;  %974 = vst [vmem:[%s946_s11 + $0x38] sm:$0xff] %v973_v50 }
 0x125   : > { %976 = vst [vmem:[%s946_s11 + $0x80] sm:$0xff] %v975_v51  ;;  %978 = vst [vmem:[%s946_s11 + $0x88] sm:$0xff] %v977_v52 }
 0x126   : > { %980 = vst [vmem:[%s946_s11 + $0x90] sm:$0xff] %v979_v53  ;;  %982 = vst [vmem:[%s946_s11 + $0x98] sm:$0xff] %v981_v54 }
 0x127   : > { %984 = vst [vmem:[%s946_s11 + $0xa0] sm:$0xff] %v983_v55  ;;  %986 = vst [vmem:[%s946_s11 + $0xa8] sm:$0xff] %v985_v56 }
 0x128   : > { %988 = vst [vmem:[%s946_s11 + $0xb0] sm:$0xff] %v987_v57  ;;  %990 = vst [vmem:[%s946_s11 + $0xb8] sm:$0xff] %v989_v58 }
 0x129 PF: > { %s17_s27 = sadd.s32 1, %s1262_s27   ;;  %s1566_s21 = smov %s1242_s22 }
 0x12a   : > { %p14_p12 = scmp.ge.s32.totalorder %s17_s27, 6   ;;  %s1567_s22 = smov %s1356_s12 }
 0x12b   : > { %s1568_s23 = smov %s1254_s25  ;;  %s1569_s24 = smov %s1258_s26 }
 0x12c   : > { %s1570_s25 = smov %s1573_s28  ;;  %s1571_s26 = smov %s1577_s29 }
 0x12d   :  { %16 = sbr.rel (!%p14_p12) target bundleno = 4 (0x4), region = 156 }

// kernel: custom-call.2
= control target key start
LH: loop header
LB: loop body
LE: loop exit
PB: predicated region body
PF: predicated region fallthrough
CT: control target
= control target key end

     0   :  { %s92_s0 = inlined_call_operand.vmem [shape: f32[2,16,8,16,16], index: 0, kind: input, shape index: {}]   ;;  %s93_s1 = inlined_call_operand.vmem [shape: f32[2,16,8,16,16], index: 1, kind: input, shape index: {}]   ;;  %s94_s2 = inlined_call_operand.hbm [shape: c64[2,16,8,16,16], index: 2, kind: output, shape index: {}]  }
   0x1   :  { %s3_s11 = scalar_lea.hbm %s94_s2, 65536 }
   0x2   :  { %4 = vsyncpa [#allocation0], 0  ;;  %s5_s14 = sshll.u32 %s92_s0, 4  ;;  %s6_s14 = int_to_ptr.vmem [resolvable:$true] %s5_s14 }
   0x3   :  { %s18_s15 = scalar_lea.vmem %s6_s14, 65536  ;;  %p23_p1 = scmp.lt.s32.totalorder %s6_s14, %s6_s14 }
   0x4   :  { %p19_p0 = scmp.ne.s32.totalorder %s6_s14, %s18_s15  ;;  %p24_p2 = scmp.lt.s32.totalorder %s18_s15, %s18_s15 }
   0x6   :  { %p25_p3 = por %p24_p2, %p23_p1 }
   0x8   :  { %p26_p4 = pnand %p25_p3, %p19_p0 }
   0xa   :  { %29 = shalt.err (!%p26_p4)  }
   0xb   :  { %8 = dma.vmem_to_hbm [thread:$0]  %s6_s14, 65536, %s94_s2, [#allocation0] }
   0xc   :  { %61 = dma.done.wait [#allocation0], 65536  }
   0xd   :  { %62 = vsyncadd [#allocation0], 4294901760 }
   0xe   :  { %10 = vsyncpa [#allocation0], 1 }
   0xf   :  { %11 = vsyncpa [#allocation1], 0  ;;  %s12_s0 = sshll.u32 %s93_s1, 4  ;;  %s13_s0 = int_to_ptr.vmem [resolvable:$true] %s12_s0 }
  0x10   :  { %s38_s20 = scalar_lea.vmem %s13_s0, 65536  ;;  %p43_p6 = scmp.lt.s32.totalorder %s13_s0, %s13_s0 }
  0x11   :  { %p39_p5 = scmp.ne.s32.totalorder %s13_s0, %s38_s20  ;;  %p44_p7 = scmp.lt.s32.totalorder %s38_s20, %s38_s20 }
  0x13   :  { %p45_p8 = por %p44_p7, %p43_p6 }
  0x15   :  { %p46_p9 = pnand %p45_p8, %p39_p5 }
  0x17   :  { %49 = shalt.err (!%p46_p9)  }
  0x18   :  { %15 = dma.vmem_to_hbm [thread:$0]  %s13_s0, 65536, %s3_s11, [#allocation1] }
  0x19   :  { %63 = dma.done.wait [#allocation1], 65536  }
  0x1a   :  { %64 = vsyncadd [#allocation1], 4294901760 }
  0x1b   :  { %17 = vsyncpa [#allocation1], 1 }

</bundles_post_ra>
